<compile_context>
chip_gen: v5e
topology: v5e:2x2
jax: 0.10.0
libtpu: 0.0.40
codegen_flags: <defaults>
</compile_context>

<pallas_src>
import math
from functools import partial

import jax
import jax.numpy as jnp
from jax.experimental import pallas as pl
from jax.experimental.pallas import tpu as pltpu

# ---- xlm-roberta-base-like config (exact widths, reduced depth) -------------
VOCAB = 128          # synthetic small vocab (real model: 250k)
HIDDEN = 768
N_HEADS = 12
HEAD_DIM = HIDDEN // N_HEADS
FFN = 3072
N_LAYERS = 2         # TODO(synk): real xlm-roberta-base has 12 layers; 2 kept for a fast synthetic demo
LN_EPS = 1e-5
BN_EPS = 1e-5
N_TOPICS = 3         # len(encode_reverse)
HEAD_PAD = 128       # lane-dense padded width for the 3-way classifier output
ACT_DTYPE = jnp.bfloat16   # inter-kernel activation dtype (halves HBM traffic)


# ------------------------------- helpers --------------------------------------
def _fit(dim, target, quantum):
    """Largest multiple of `quantum` <= target that evenly divides dim.

    Falls back to the full dim (always a legal block) if no such tile exists,
    so blocks are always (16,128)-friendly or full-extent -> unmasked vld/vst.
    """
    if dim <= target:
        return dim
    t = (target // quantum) * quantum
    while t >= quantum:
        if dim % t == 0:
            return t
        t -= quantum
    return dim


def _gelu(x):
    # TODO(synk): HF uses exact erf-GELU; tanh approximation is Mosaic-friendly.
    c = math.sqrt(2.0 / math.pi)
    return 0.5 * x * (1.0 + jnp.tanh(c * (x + 0.044715 * x * x * x)))


def _mish(x):
    sp = jnp.maximum(x, 0.0) + jnp.log1p(jnp.exp(-jnp.abs(x)))  # stable softplus
    return x * jnp.tanh(sp)


# --------------------------- tiled linear kernel -------------------------------
def _linear_kernel(x_ref, w_ref, b_ref, o_ref, *, act):
    x = x_ref[...].astype(jnp.bfloat16)
    w = w_ref[...].astype(jnp.bfloat16)
    y = jnp.dot(x, w, preferred_element_type=jnp.float32) + b_ref[...]
    if act == "gelu":
        y = _gelu(y)
    o_ref[...] = y.astype(o_ref.dtype)


def linear(x, w, b, act=None, tm=512, tn=512):
    # bf16 activations + bf16 weights: double-buffered tiles stay far below the
    # 32 MiB default scoped VMEM (safe on v7x's 64 MiB physical VMEM).
    # TODO(synk): on v5e/v6e (128 MiB VMEM) a 3-deep pl.Buffered weight spec
    # could hide the weight-tile DMA when M//tm is small.
    M, K = x.shape
    _, N = w.shape
    tm = _fit(M, tm, 16)
    tn = _fit(N, tn, 128)
    return pl.pallas_call(
        partial(_linear_kernel, act=act),
        out_shape=jax.ShapeDtypeStruct((M, N), ACT_DTYPE),
        grid=(M // tm, N // tn),
        in_specs=[
            pl.BlockSpec((tm, K), lambda i, j: (i, 0)),
            pl.BlockSpec((K, tn), lambda i, j: (0, j)),
            pl.BlockSpec((1, tn), lambda i, j: (0, j)),
        ],
        out_specs=pl.BlockSpec((tm, tn), lambda i, j: (i, j)),
        compiler_params=pltpu.CompilerParams(
            dimension_semantics=("parallel", "parallel")),
    )(x, w, b.reshape(1, N))


# ------------------ linear + residual-add + LayerNorm (fused) ------------------
def _linear_add_ln_kernel(x_ref, w_ref, b_ref, r_ref, g_ref, bb_ref, o_ref):
    x = x_ref[...].astype(jnp.bfloat16)
    w = w_ref[...].astype(jnp.bfloat16)
    h = (jnp.dot(x, w, preferred_element_type=jnp.float32)
         + b_ref[...] + r_ref[...].astype(jnp.float32))
    mu = jnp.mean(h, axis=-1, keepdims=True)
    var = jnp.mean((h - mu) ** 2, axis=-1, keepdims=True)
    o_ref[...] = ((h - mu) * jax.lax.rsqrt(var + LN_EPS) * g_ref[...]
                  + bb_ref[...]).astype(o_ref.dtype)


def linear_add_layernorm(x, w, b, residual, gamma, beta, tm=256):
    # N stays whole (LayerNorm reduces over it); rows tiled + parallel.
    M, K = x.shape
    _, N = w.shape
    tm = _fit(M, tm, 16)
    return pl.pallas_call(
        _linear_add_ln_kernel,
        out_shape=jax.ShapeDtypeStruct((M, N), ACT_DTYPE),
        grid=(M // tm,),
        in_specs=[
            pl.BlockSpec((tm, K), lambda i: (i, 0)),
            pl.BlockSpec((K, N), lambda i: (0, 0)),
            pl.BlockSpec((1, N), lambda i: (0, 0)),
            pl.BlockSpec((tm, N), lambda i: (i, 0)),
            pl.BlockSpec((1, N), lambda i: (0, 0)),
            pl.BlockSpec((1, N), lambda i: (0, 0)),
        ],
        out_specs=pl.BlockSpec((tm, N), lambda i: (i, 0)),
        compiler_params=pltpu.CompilerParams(dimension_semantics=("parallel",)),
    )(x, w, b.reshape(1, N), residual, gamma.reshape(1, N), beta.reshape(1, N))


# --------------------------- LayerNorm-only kernel -----------------------------
# TODO(synk): this standalone LN (embeddings only) could be fused as a prologue
# into the first QKV GEMM, but its normalized output is also the residual for
# the attention-output LN, so it would need a second output; kept standalone.
def _ln_kernel(x_ref, g_ref, b_ref, o_ref):
    h = x_ref[...].astype(jnp.float32)
    mu = jnp.mean(h, axis=-1, keepdims=True)
    var = jnp.mean((h - mu) ** 2, axis=-1, keepdims=True)
    o_ref[...] = ((h - mu) * jax.lax.rsqrt(var + LN_EPS) * g_ref[...]
                  + b_ref[...]).astype(o_ref.dtype)


def layernorm(x, gamma, beta, tm=512):
    M, H = x.shape
    tm = _fit(M, tm, 16)
    return pl.pallas_call(
        _ln_kernel,
        out_shape=jax.ShapeDtypeStruct((M, H), ACT_DTYPE),
        grid=(M // tm,),
        in_specs=[
            pl.BlockSpec((tm, H), lambda i: (i, 0)),
            pl.BlockSpec((1, H), lambda i: (0, 0)),
            pl.BlockSpec((1, H), lambda i: (0, 0)),
        ],
        out_specs=pl.BlockSpec((tm, H), lambda i: (i, 0)),
        compiler_params=pltpu.CompilerParams(dimension_semantics=("parallel",)),
    )(x, gamma.reshape(1, H), beta.reshape(1, H))


# ---------------- attention: fused-QKV input, lane-dense output ----------------
def _attn_kernel(qkv_ref, m_ref, o_ref, *, scale):
    # qkv_ref: (1, S, 3*HIDDEN) bf16 laid out [Q | K | V]; m_ref: (1, 1, S) f32
    # o_ref:   (1, S, HIDDEN) bf16 -- lane-dense block, one unmasked HBM store.
    m = m_ref[0]                                            # (1, S)
    # Static per-head loop: only one (S, S) score tensor live at a time; all
    # head slices are static 64-wide windows of the VMEM-resident QKV block.
    # TODO(synk): for long sequences, tile the grid over (B, heads) and the
    # query rows flash-style; at demo sizes the per-batch step is cheapest.
    for h in range(N_HEADS):
        q = qkv_ref[0, :, h * HEAD_DIM:(h + 1) * HEAD_DIM] * scale      # bf16 (S, D)
        k = qkv_ref[0, :, HIDDEN + h * HEAD_DIM:HIDDEN + (h + 1) * HEAD_DIM]
        v = qkv_ref[0, :, 2 * HIDDEN + h * HEAD_DIM:2 * HIDDEN + (h + 1) * HEAD_DIM]
        s = jax.lax.dot_general(q, k, (((1,), (1,)), ((), ())),
                                preferred_element_type=jnp.float32)     # (S, S)
        s = s + m
        s = s - jnp.max(s, axis=-1, keepdims=True)
        p = jnp.exp(s)
        p = p * pl.reciprocal(jnp.sum(p, axis=-1, keepdims=True), approx=True)
        ctx = jnp.dot(p.astype(jnp.bfloat16), v,
                      preferred_element_type=jnp.float32)               # (S, D)
        o_ref[0, :, h * HEAD_DIM:(h + 1) * HEAD_DIM] = ctx.astype(o_ref.dtype)


def attention(qkv, add_mask):
    # qkv: (B, S, 3*HIDDEN) bf16 straight from the fused QKV GEMM (no relayout);
    # add_mask: (B, 1, S) additive (-10000 where masked).
    B, S, _ = qkv.shape
    return pl.pallas_call(
        partial(_attn_kernel, scale=1.0 / math.sqrt(HEAD_DIM)),
        out_shape=jax.ShapeDtypeStruct((B, S, HIDDEN), ACT_DTYPE),
        grid=(B,),
        in_specs=[
            pl.BlockSpec((1, S, 3 * HIDDEN), lambda b: (b, 0, 0)),
            pl.BlockSpec((1, 1, S), lambda b: (b, 0, 0)),
        ],
        out_specs=pl.BlockSpec((1, S, HIDDEN), lambda b: (b, 0, 0)),
        compiler_params=pltpu.CompilerParams(dimension_semantics=("parallel",)),
    )(qkv, add_mask)


# ----------------------- fused pooler + multilabel head ------------------------
def _head_kernel(cls_ref, pw, pb, w1, b1, s1, t1, w2, b2, s2, t2, w3, b3, o_ref):
    # pooler: tanh(cls @ Wp + bp), then
    # Linear(768,256) -> Mish -> BN(256) -> [Dropout=id] ->
    # Linear(256,64)  -> Mish -> BN(64)  -> [Dropout=id] -> Linear(64,3 padded to 128)
    x = cls_ref[...].astype(jnp.bfloat16)
    h = jnp.tanh(jnp.dot(x, pw[...].astype(jnp.bfloat16),
                         preferred_element_type=jnp.float32) + pb[...])
    h = jnp.dot(h.astype(jnp.bfloat16), w1[...].astype(jnp.bfloat16),
                preferred_element_type=jnp.float32) + b1[...]
    h = _mish(h)
    h = h * s1[...] + t1[...]                  # eval-mode BatchNorm1d, stats folded
    h = jnp.dot(h.astype(jnp.bfloat16), w2[...].astype(jnp.bfloat16),
                preferred_element_type=jnp.float32) + b2[...]
    h = _mish(h)
    h = h * s2[...] + t2[...]
    o_ref[...] = (jnp.dot(h.astype(jnp.bfloat16), w3[...].astype(jnp.bfloat16),
                          preferred_element_type=jnp.float32) + b3[...]).astype(o_ref.dtype)


def pooler_and_head(cls, pool_w, pool_b, p):
    B, _ = cls.shape
    bn1_scale = p["bn1_gamma"] / jnp.sqrt(p["bn1_var"] + BN_EPS)
    bn1_shift = p["bn1_beta"] - p["bn1_mean"] * bn1_scale
    bn2_scale = p["bn2_gamma"] / jnp.sqrt(p["bn2_var"] + BN_EPS)
    bn2_shift = p["bn2_beta"] - p["bn2_mean"] * bn2_scale

    args = [
        cls, pool_w, pool_b.reshape(1, -1),
        p["w1"], p["b1"].reshape(1, -1), bn1_scale.reshape(1, -1), bn1_shift.reshape(1, -1),
        p["w2"], p["b2"].reshape(1, -1), bn2_scale.reshape(1, -1), bn2_shift.reshape(1, -1),
        p["w3"], p["b3"].reshape(1, -1),
    ]
    out = pl.pallas_call(
        _head_kernel,
        out_shape=jax.ShapeDtypeStruct((B, HEAD_PAD), jnp.float32),
        grid=(1,),
        in_specs=[pl.BlockSpec(a.shape, lambda i: (0, 0)) for a in args],
        out_specs=pl.BlockSpec((B, HEAD_PAD), lambda i: (0, 0)),
        compiler_params=pltpu.CompilerParams(dimension_semantics=("arbitrary",)),
    )(*args)
    return out[:, :N_TOPICS]


# ------------------------------- model glue -----------------------------------
def my_bert_forward(params, input_ids, attention_mask,
                    output_hidden_states=None, output_attentions=None):
    B, S = input_ids.shape

    emb = (params["word_emb"][input_ids]
           + params["pos_emb"][jnp.arange(S)][None, :, :]
           + params["type_emb"][0][None, None, :])
    x = emb.reshape(B * S, HIDDEN).astype(jnp.float32)
    x = layernorm(x, params["emb_ln_g"], params["emb_ln_b"])          # bf16 out

    # additive mask kept at (B, 1, S) -- broadcast across heads inside the kernel
    add_mask = ((1.0 - attention_mask.astype(jnp.float32)) * -10000.0).reshape(B, 1, S)

    hidden_states = [x.reshape(B, S, HIDDEN)]
    for layer in params["layers"]:
        # fused QKV projection: one (768, 2304) GEMM; kept in [Q|K|V] layout so
        # the attention kernel reads it directly (no reshape/transpose relayout).
        qkv = linear(x, layer["w_qkv"], layer["b_qkv"])                # (B*S, 2304) bf16
        ctx = attention(qkv.reshape(B, S, 3 * HIDDEN), add_mask)      # (B, S, 768) bf16
        ctx = ctx.reshape(B * S, HIDDEN)

        # attention output proj + residual + LayerNorm fused in one kernel
        x = linear_add_layernorm(ctx, layer["wo"], layer["bo"],
                                 x, layer["ln1_g"], layer["ln1_b"])

        ffn = linear(x, layer["w_in"], layer["b_in"], act="gelu")
        # FFN output proj + residual + LayerNorm fused in one kernel
        x = linear_add_layernorm(ffn, layer["w_out"], layer["b_out"],
                                 x, layer["ln2_g"], layer["ln2_b"])
        hidden_states.append(x.reshape(B, S, HIDDEN))

    seq_out = x.reshape(B, S, HIDDEN)
    cls = seq_out[:, 0, :]                                            # pooler uses token 0
    logits = pooler_and_head(cls, params["pool_w"], params["pool_b"], params["head"])

    if output_hidden_states:
        return tuple(hidden_states)
    elif output_attentions:
        # TODO(synk): attention probabilities are not materialized out of the fused kernel.
        return ()
    return logits


# ----------------------------- parameter init ---------------------------------
def init_params(key):
    std = 0.02
    keys = iter(jax.random.split(key, 256))

    def nrm(shape, dtype=jnp.float32):
        return (std * jax.random.normal(next(keys), shape)).astype(dtype)

    def layer_params():
        wq, wk, wv = nrm((HIDDEN, HIDDEN)), nrm((HIDDEN, HIDDEN)), nrm((HIDDEN, HIDDEN))
        bq, bk, bv = nrm((HIDDEN,)), nrm((HIDDEN,)), nrm((HIDDEN,))
        return dict(
            # matmul weights stored in bf16 (halves weight HBM traffic); biases/LN in f32
            w_qkv=jnp.concatenate([wq, wk, wv], axis=1).astype(jnp.bfloat16),
            b_qkv=jnp.concatenate([bq, bk, bv]),
            wo=nrm((HIDDEN, HIDDEN), jnp.bfloat16), bo=nrm((HIDDEN,)),
            ln1_g=jnp.ones((HIDDEN,), jnp.float32), ln1_b=jnp.zeros((HIDDEN,), jnp.float32),
            w_in=nrm((HIDDEN, FFN), jnp.bfloat16), b_in=nrm((FFN,)),
            w_out=nrm((FFN, HIDDEN), jnp.bfloat16), b_out=nrm((HIDDEN,)),
            ln2_g=jnp.ones((HIDDEN,), jnp.float32), ln2_b=jnp.zeros((HIDDEN,), jnp.float32),
        )

    w3 = nrm((64, N_TOPICS))
    b3 = nrm((N_TOPICS,))
    head = dict(
        w1=nrm((HIDDEN, 256), jnp.bfloat16), b1=nrm((256,)),
        bn1_gamma=jnp.ones((256,), jnp.float32), bn1_beta=jnp.zeros((256,), jnp.float32),
        bn1_mean=nrm((256,)), bn1_var=jnp.abs(nrm((256,))) + 1.0,
        w2=nrm((256, 64), jnp.bfloat16), b2=nrm((64,)),
        bn2_gamma=jnp.ones((64,), jnp.float32), bn2_beta=jnp.zeros((64,), jnp.float32),
        bn2_mean=nrm((64,)), bn2_var=jnp.abs(nrm((64,))) + 1.0,
        # zero-pad the 3-wide classifier to lane-dense 128 (unmasked final store)
        w3=jnp.zeros((64, HEAD_PAD), jnp.bfloat16).at[:, :N_TOPICS].set(w3.astype(jnp.bfloat16)),
        b3=jnp.zeros((HEAD_PAD,), jnp.float32).at[:N_TOPICS].set(b3),
    )

    return dict(
        word_emb=nrm((VOCAB, HIDDEN)),
        pos_emb=nrm((64, HIDDEN)),
        type_emb=nrm((1, HIDDEN)),
        emb_ln_g=jnp.ones((HIDDEN,), jnp.float32),
        emb_ln_b=jnp.zeros((HIDDEN,), jnp.float32),
        layers=[layer_params() for _ in range(N_LAYERS)],
        pool_w=nrm((HIDDEN, HIDDEN), jnp.bfloat16), pool_b=nrm((HIDDEN,)),
        head=head,
    )


if __name__ == "__main__":
    key = jax.random.PRNGKey(0)
    pkey, dkey = jax.random.split(key)
    params = init_params(pkey)

    B, S = 2, 16
    input_ids = jax.random.randint(dkey, (B, S), 0, VOCAB, dtype=jnp.int32)
    attention_mask = jnp.ones((B, S), jnp.float32).at[1, 12:].set(0.0)  # pad last 4 of row 1

    logits = my_bert_forward(params, input_ids, attention_mask)
    logits = jax.block_until_ready(logits)

    assert logits.shape == (B, N_TOPICS), logits.shape
    assert bool(jnp.all(jnp.isfinite(logits)))
    print("KERNEL_OK")
</pallas_src>

<mosaic_0001>
module attributes {stable_mosaic.version = 11 : i64} {
  func.func @_ln_kernel(%arg0: i32, %arg1: memref<32x768xf32, #tpu.memory_space<vmem>>, %arg2: memref<1x768xf32, #tpu.memory_space<vmem>>, %arg3: memref<1x768xf32, #tpu.memory_space<vmem>>, %arg4: memref<32x768xbf16, #tpu.memory_space<vmem>>) attributes {dimension_semantics = [#tpu.dimension_semantics<parallel>], iteration_bounds = array<i64: 1>, scalar_prefetch = 0 : i64, scratch_operands = 0 : i64, tpu.core_type = #tpu.core_type<tc>, window_params = [{transform_indices = @transform_0, window_bounds = array<i64: 32, 768>}, {pipeline_mode = #tpu.pipeline_mode<synchronous>, transform_indices = @transform_1, window_bounds = array<i64: 1, 768>}, {pipeline_mode = #tpu.pipeline_mode<synchronous>, transform_indices = @transform_2, window_bounds = array<i64: 1, 768>}, {transform_indices = @transform_3, window_bounds = array<i64: 32, 768>}]} {
    %c0 = arith.constant 0 : index
    %c0_0 = arith.constant 0 : index
    %0 = vector.load %arg1[%c0, %c0_0] : memref<32x768xf32, #tpu.memory_space<vmem>>, vector<32x768xf32>
    %cst = arith.constant dense<0.000000e+00> : vector<32xf32>
    %1 = vector.multi_reduction <add>, %0, %cst [1] : vector<32x768xf32> to vector<32xf32>
    %2 = vector.shape_cast %1 : vector<32xf32> to vector<32x1xf32>
    %cst_1 = arith.constant 7.680000e+02 : f32
    %3 = vector.broadcast %cst_1 : f32 to vector<32x1xf32>
    %4 = arith.divf %2, %3 : vector<32x1xf32>
    %5 = vector.broadcast %4 : vector<32x1xf32> to vector<32x768xf32>
    %6 = arith.subf %0, %5 : vector<32x768xf32>
    %7 = arith.mulf %6, %6 : vector<32x768xf32>
    %cst_2 = arith.constant dense<0.000000e+00> : vector<32xf32>
    %8 = vector.multi_reduction <add>, %7, %cst_2 [1] : vector<32x768xf32> to vector<32xf32>
    %9 = vector.shape_cast %8 : vector<32xf32> to vector<32x1xf32>
    %cst_3 = arith.constant 7.680000e+02 : f32
    %10 = vector.broadcast %cst_3 : f32 to vector<32x1xf32>
    %11 = arith.divf %9, %10 : vector<32x1xf32>
    %12 = vector.broadcast %4 : vector<32x1xf32> to vector<32x768xf32>
    %13 = arith.subf %0, %12 : vector<32x768xf32>
    %cst_4 = arith.constant 9.99999974E-6 : f32
    %14 = vector.broadcast %cst_4 : f32 to vector<32x1xf32>
    %15 = arith.addf %11, %14 : vector<32x1xf32>
    %16 = math.rsqrt %15 : vector<32x1xf32>
    %17 = vector.broadcast %16 : vector<32x1xf32> to vector<32x768xf32>
    %18 = arith.mulf %13, %17 : vector<32x768xf32>
    %c0_5 = arith.constant 0 : index
    %c0_6 = arith.constant 0 : index
    %19 = vector.load %arg2[%c0_5, %c0_6] : memref<1x768xf32, #tpu.memory_space<vmem>>, vector<1x768xf32>
    %20 = vector.broadcast %19 : vector<1x768xf32> to vector<32x768xf32>
    %21 = arith.mulf %18, %20 : vector<32x768xf32>
    %c0_7 = arith.constant 0 : index
    %c0_8 = arith.constant 0 : index
    %22 = vector.load %arg3[%c0_7, %c0_8] : memref<1x768xf32, #tpu.memory_space<vmem>>, vector<1x768xf32>
    %23 = vector.broadcast %22 : vector<1x768xf32> to vector<32x768xf32>
    %24 = arith.addf %21, %23 : vector<32x768xf32>
    %25 = arith.truncf %24 : vector<32x768xf32> to vector<32x768xbf16>
    %c0_9 = arith.constant 0 : index
    %c0_10 = arith.constant 0 : index
    %26 = vector.load %arg4[%c0_9, %c0_10] : memref<32x768xbf16, #tpu.memory_space<vmem>>, vector<32x768xbf16>
    tpu.vector_store %arg4[%c0_9, %c0_10], %25 {strides = array<i32>} : memref<32x768xbf16, #tpu.memory_space<vmem>>, vector<32x768xbf16>,
    return
  }
  func.func @transform_0(%arg0: i32) -> (i32, i32) {
    %c0_i32 = arith.constant 0 : i32
    %c0_i32_0 = arith.constant 0 : i32
    return %arg0, %c0_i32 : i32, i32
  }
  func.func @transform_1(%arg0: i32) -> (i32, i32) {
    %c0_i32 = arith.constant 0 : i32
    %c0_i32_0 = arith.constant 0 : i32
    %c0_i32_1 = arith.constant 0 : i32
    return %c0_i32, %c0_i32_0 : i32, i32
  }
  func.func @transform_2(%arg0: i32) -> (i32, i32) {
    %c0_i32 = arith.constant 0 : i32
    %c0_i32_0 = arith.constant 0 : i32
    %c0_i32_1 = arith.constant 0 : i32
    return %c0_i32, %c0_i32_0 : i32, i32
  }
  func.func @transform_3(%arg0: i32) -> (i32, i32) {
    %c0_i32 = arith.constant 0 : i32
    %c0_i32_0 = arith.constant 0 : i32
    return %arg0, %c0_i32 : i32, i32
  }
}

</mosaic_0001>

<bundles_post_ra>
// kernel: tpu_custom_call.1
= control target key start
LH: loop header
LB: loop body
LE: loop exit
PB: predicated region body
PF: predicated region fallthrough
CT: control target
= control target key end

     0   :  { %8 = vsyncpa [#allocation3], 0  ;;  %s852_s0 = inlined_call_operand.hbm [shape: f32[32,768], index: 0, kind: input, shape index: {}]   ;;  %s853_s1 = inlined_call_operand.hbm [shape: f32[1,768], index: 1, kind: input, shape index: {}]   ;;  %s854_s2 = inlined_call_operand.hbm [shape: f32[1,768], index: 2, kind: input, shape index: {}]   ;;  %s855_s3 = inlined_call_operand.hbm [shape: bf16[32,768], index: 3, kind: output, shape index: {}]  }
   0x1   :  { %9 = vsyncpa [#allocation6], 0  ;;  %s29_s14 = sshll.u32 %s853_s1, 4  ;;  %s30_s14 = int_to_ptr.hbm [resolvable:$true] %s29_s14 }
   0x2   :  { %10 = vsyncpa [#allocation4], 0  ;;  %s510_s15 = smov [#allocation5]   ;;  %s15_s19 = sshll.u32 %s852_s0, 4  ;;  %s16_s19 = int_to_ptr.hbm [resolvable:$true] %s15_s19 }
   0x3   :  { %s31_s16 = sshll.u32 %s510_s15, 4  ;;  %s511_s20 = smov [#allocation2]   ;;  %s32_s16 = int_to_ptr.vmem [resolvable:$true] %s31_s16 }
   0x4   :  { %34 = dma.hbm_to_vmem [thread:$0]  %s30_s14, 96, %s32_s16, [#allocation6]  }
   0x5   :  { %s17_s21 = sshll.u32 %s511_s20, 4  ;;  %s512_s22 = smov 768   ;;  %s18_s21 = int_to_ptr.vmem [resolvable:$true] %s17_s21 }
   0x6   :  { %s513_s23 = smov 48   ;;  %s40_s1 = sshll.u32 %s854_s2, 4  ;;  %s41_s1 = int_to_ptr.hbm [resolvable:$true] %s40_s1 }
   0x7   :  { %23 = dma.hbm_to_vmem [thread:$0]  %s16_s19, 3072, %s18_s21, [#allocation3], %s512_s22, %s512_s22, %s513_s23  }
   0x8   :  { %s514_s26 = smov [#allocation7]  }
   0x9   :  { %s42_s27 = sshll.u32 %s514_s26, 4  ;;  %s43_s27 = int_to_ptr.vmem [resolvable:$true] %s42_s27 }
   0xa   :  { %45 = dma.hbm_to_vmem [thread:$0]  %s41_s1, 96, %s43_s27, [#allocation6]  }
   0xb   :  { %504 = dma.done.wait [#allocation3], 3072  }
   0xc   :  { %505 = vsyncadd [#allocation3], 4294964224 }
   0xd   :  { %506 = dma.done.wait [#allocation6], 192  }
   0xe   :  { %507 = vsyncadd [#allocation6], 4294967104  ;;  %v70_v0 = vld [vmem:[#allocation2 + $0x60] sm:$0xff]  ;;  %v71_v1 = vld [vmem:[#allocation2 + $0x68] sm:$0xff]  ;;  %v515_v44 = vmov 768.0   ;;  %s516_s0 = smov [#allocation8]  }
   0xf   :  { %v72_v2 = vld [vmem:[#allocation2 + $0x70] sm:$0xff]  ;;  %v73_v3 = vld [vmem:[#allocation2 + $0x78] sm:$0xff]  ;;  %v96_v4 = vadd.f32 %v71_v1, %v70_v0  ;;  %v548_v5 = vld [vmem:[#allocation2] sm:$0xff]  ;;  %398 = vrcp.f32 %v515_v44  ;;  %s373_s2 = sshll.u32 %s516_s0, 4  ;;  %s375_s30 = sshll.u32 %s855_s3, 4  ;;  %s374_s2 = int_to_ptr.vmem [resolvable:$true] %s373_s2  ;;  %s376_s30 = int_to_ptr.hbm [resolvable:$true] %s375_s30 }
  0x10   :  { %v550_v6 = vld [vmem:[#allocation2 + $0x8] sm:$0xff]  ;;  %v552_v7 = vld [vmem:[#allocation2 + $0x10] sm:$0xff]  ;;  %v74_v8 = vld [vmem:[#allocation2 + $0x80] sm:$0xff]  ;;  %s517_s4 = smov 384   ;;  %s518_s5 = smov 24  }
  0x11   :  { %v97_v9 = vadd.f32 %v96_v4, %v72_v2  ;;  %v554_v10 = vld [vmem:[#allocation2 + $0x18] sm:$0xff]  ;;  %v82_v11 = vadd.f32 %v550_v6, %v548_v5  ;;  %v558_v12 = vld [vmem:[#allocation2 + $0x90] sm:$0xff]  ;;  %v562_v14 = vld [vmem:[#allocation2 + $0xa0] sm:$0xff] }
  0x12   :  { %v560_v13 = vld [vmem:[#allocation2 + $0x98] sm:$0xff]  ;;  %v75_v15 = vld [vmem:[#allocation2 + $0x88] sm:$0xff]  ;;  %v564_v17 = vld [vmem:[#allocation2 + $0x20] sm:$0xff] }
  0x13   :  { %v98_v16 = vadd.f32 %v97_v9, %v73_v3  ;;  %v83_v18 = vadd.f32 %v82_v11, %v552_v7  ;;  %v567_v19 = vld [vmem:[#allocation2 + $0xa8] sm:$0xff]  ;;  %v103_v20 = vadd.f32 %v560_v13, %v558_v12  ;;  %v571_v21 = vld [vmem:[#allocation2 + $0x30] sm:$0xff]  ;;  %v573_v22 = vld [vmem:[#allocation2 + $0x38] sm:$0xff] }
  0x14   :  { %v575_v23 = vld [vmem:[#allocation2 + $0x40] sm:$0xff]  ;;  %v89_v27 = vadd.f32 %v573_v22, %v571_v21  ;;  %v581_v28 = vld [vmem:[#allocation2 + $0x28] sm:$0xff]  ;;  %v583_v29 = vld [vmem:[#allocation2 + $0xb0] sm:$0xff] }
  0x15   :  { %v99_v24 = vadd.f32 %v98_v16, %v74_v8  ;;  %v84_v25 = vadd.f32 %v83_v18, %v554_v10  ;;  %v104_v26 = vadd.f32 %v103_v20, %v562_v14  ;;  %v585_v30 = vld [vmem:[#allocation2 + $0x48] sm:$0xff]  ;;  %v590_v35 = vld [vmem:[#allocation2 + $0x50] sm:$0xff]  ;;  %v595_v39 = vld [vmem:[#allocation2 + $0xb8] sm:$0xff]  ;;  %v399_v45 = vpop.eup %398 }
  0x16   :  { %v90_v34 = vadd.f32 %v89_v27, %v575_v23  ;;  %v598_v41 = vld [vmem:[#allocation2 + $0x58] sm:$0xff]  ;;  %v111_v46 = vmul.f32 768.0, %v399_v45  ;;  %vm115_vm0 = vweird.f32 %v399_v45 }
  0x17   :  { %v100_v31 = vadd.f32 %v99_v24, %v75_v15  ;;  %v85_v32 = vadd.f32 %v84_v25, %v564_v17  ;;  %v105_v33 = vadd.f32 %v104_v26, %v567_v19 }
  0x18   :  { %v91_v38 = vadd.f32 %v90_v34, %v585_v30  ;;  %v112_v47 = vsub.f32 1.0, %v111_v46 }
  0x19   :  { %101 = vadd.xlane.f32.xlu1 %v100_v31  ;;  %v86_v36 = vadd.f32 %v85_v32, %v581_v28  ;;  %v106_v37 = vadd.f32 %v105_v33, %v583_v29 }
  0x1a   :  { %v92_v40 = vadd.f32 %v91_v38, %v590_v35  ;;  %v113_v48 = vmul.f32 %v399_v45, %v112_v47 }
  0x1b   :  { %87 = vadd.xlane.f32.xlu0 %v86_v36  ;;  %v107_v42 = vadd.f32 %v106_v37, %v595_v39 }
  0x1c   :  { %v93_v43 = vadd.f32 %v92_v40, %v598_v41  ;;  %v114_v49 = vadd.f32 %v399_v45, %v113_v48 }
  0x1e   :  { %v602_v50 = vsel %vm115_vm0, %v399_v45, %v114_v49 }
  0x21   :  { %108 = vadd.xlane.f32.xlu1 %v107_v42 }
  0x23   :  { %94 = vadd.xlane.f32.xlu0 %v93_v43 }
  0x8c   :  { %v102_v51 = vpop.xlane.xlu1 %101 }
  0x8d   :  { %v119_v52 = vmul.f32 %v602_v50, %v102_v51 }
  0x8e   :  { %v88_v53 = vpop.xlane.xlu0 %87 }
  0x8f   :  { %v117_v54 = vmul.f32 %v602_v50, %v88_v53  ;;  %v606_v55 = vsub.f32 %v70_v0, %v119_v52  ;;  %v608_v56 = vsub.f32 %v71_v1, %v119_v52  ;;  %v610_v57 = vsub.f32 %v72_v2, %v119_v52 }
  0x90   :  { %v612_v58 = vsub.f32 %v73_v3, %v119_v52  ;;  %v614_v59 = vsub.f32 %v74_v8, %v119_v52  ;;  %v623_v63 = vsub.f32 %v75_v15, %v119_v52 }
  0x91   :  { %v157_v60 = vmul.f32 %v606_v55, %v606_v55  ;;  %v158_v61 = vmul.f32 %v608_v56, %v608_v56  ;;  %v621_v62 = vsub.f32 %v548_v5, %v117_v54  ;;  %v626_v0 = vsub.f32 %v550_v6, %v117_v54 }
  0x92   :  { %v159_v1 = vmul.f32 %v610_v57, %v610_v57  ;;  %v631_v3 = vsub.f32 %v552_v7, %v117_v54  ;;  %v634_v8 = vsub.f32 %v554_v10, %v117_v54  ;;  %v160_v11 = vmul.f32 %v612_v58, %v612_v58 }
  0x93   :  { %v183_v2 = vadd.f32 %v158_v61, %v157_v60  ;;  %v145_v5 = vmul.f32 %v621_v62, %v621_v62  ;;  %v146_v9 = vmul.f32 %v626_v0, %v626_v0  ;;  %v161_v15 = vmul.f32 %v614_v59, %v614_v59 }
  0x94   :  { %v109_v4 = vpop.xlane.xlu1 %108  ;;  %v162_v10 = vmul.f32 %v623_v63, %v623_v63  ;;  %v648_v18 = vsub.f32 %v564_v17, %v117_v54  ;;  %v147_v20 = vmul.f32 %v631_v3, %v631_v3  ;;  %v660_v32 = vsub.f32 %v581_v28, %v117_v54 }
  0x95   :  { %v120_v6 = vmul.f32 %v602_v50, %v109_v4  ;;  %v184_v7 = vadd.f32 %v183_v2, %v159_v1  ;;  %v169_v24 = vadd.f32 %v146_v9, %v145_v5  ;;  %v148_v17 = vmul.f32 %v634_v8, %v634_v8 }
  0x96   :  { %v95_v16 = vpop.xlane.xlu0 %94  ;;  %v149_v28 = vmul.f32 %v648_v18, %v648_v18  ;;  %v150_v44 = vmul.f32 %v660_v32, %v660_v32 }
  0x97   :  { %v118_v25 = vmul.f32 %v602_v50, %v95_v16  ;;  %v185_v26 = vadd.f32 %v184_v7, %v160_v11  ;;  %v654_v27 = vsub.f32 %v558_v12, %v120_v6  ;;  %v657_v31 = vsub.f32 %v560_v13, %v120_v6 }
  0x98   :  { %v170_v33 = vadd.f32 %v169_v24, %v147_v20  ;;  %v665_v34 = vsub.f32 %v562_v14, %v120_v6  ;;  %v668_v37 = vsub.f32 %v567_v19, %v120_v6  ;;  %v677_v40 = vsub.f32 %v583_v29, %v120_v6 }
  0x99   :  { %v186_v36 = vadd.f32 %v185_v26, %v161_v15  ;;  %v163_v12 = vmul.f32 %v654_v27, %v654_v27  ;;  %v164_v13 = vmul.f32 %v657_v31, %v657_v31  ;;  %v682_v19 = vsub.f32 %v571_v21, %v118_v25 }
  0x9a   :  { %v171_v38 = vadd.f32 %v170_v33, %v148_v17  ;;  %v165_v14 = vmul.f32 %v665_v34, %v665_v34  ;;  %v687_v46 = vsub.f32 %v573_v22, %v118_v25  ;;  %v690_v47 = vsub.f32 %v575_v23, %v118_v25 }
  0x9b   :  { %v187_v42 = vadd.f32 %v186_v36, %v162_v10  ;;  %v190_v43 = vadd.f32 %v164_v13, %v163_v12  ;;  %v693_v29 = vsub.f32 %v595_v39, %v120_v6  ;;  %v166_v48 = vmul.f32 %v668_v37, %v668_v37  ;;  %v269_v12 = vld [vmem:[#allocation5] sm:$0x3f] }
  0x9c   :  { %v172_v45 = vadd.f32 %v171_v38, %v149_v28  ;;  %v151_v21 = vmul.f32 %v682_v19, %v682_v19  ;;  %v700_v52 = vsub.f32 %v585_v30, %v118_v25  ;;  %v152_v22 = vmul.f32 %v687_v46, %v687_v46 }
  0x9d   :  { %188 = vadd.xlane.f32.xlu0 %v187_v42  ;;  %v191_v49 = vadd.f32 %v190_v43, %v165_v14  ;;  %v167_v23 = vmul.f32 %v677_v40, %v677_v40  ;;  %v707_v39 = vsub.f32 %v590_v35, %v118_v25  ;;  %v153_v54 = vmul.f32 %v690_v47, %v690_v47 }
  0x9e   :  { %v173_v51 = vadd.f32 %v172_v45, %v150_v44  ;;  %v176_v60 = vadd.f32 %v152_v22, %v151_v21  ;;  %v168_v61 = vmul.f32 %v693_v29, %v693_v29  ;;  %v714_v1 = vsub.f32 %v598_v41, %v118_v25  ;;  %v307_v45 = vld [vmem:[#allocation7] sm:$0x3f] }
  0x9f   :  { %v192_v53 = vadd.f32 %v191_v49, %v166_v48  ;;  %v154_v2 = vmul.f32 %v700_v52, %v700_v52  ;;  %v155_v35 = vmul.f32 %v707_v39, %v707_v39  ;;  %v729_v43 = vperm.slane %v269_v12, 0 }
  0xa0   :  { %174 = vadd.xlane.f32.xlu2 %v173_v51  ;;  %v177_v4 = vadd.f32 %v176_v60, %v153_v54  ;;  %v156_v6 = vmul.f32 %v714_v1, %v714_v1  ;;  %v731_v44 = vperm.slane %v269_v12, 1  ;;  %v733_v49 = vperm.slane %v269_v12, 2 }
  0xa1   :  { %v193_v30 = vadd.f32 %v192_v53, %v167_v23  ;;  %v735_v21 = vperm.slane %v269_v12, 3  ;;  %v737_v51 = vperm.slane %v269_v12, 4  ;;  %v739_v23 = vperm.slane %v269_v12, 5 }
  0xa2   :  { %v178_v9 = vadd.f32 %v177_v4, %v154_v2  ;;  %v745_v60 = vperm.slane %v307_v45, 0  ;;  %v751_v4 = vperm.slane %v307_v45, 3 }
  0xa3   :  { %v194_v5 = vadd.f32 %v193_v30, %v168_v61  ;;  %v747_v61 = vperm.slane %v307_v45, 1  ;;  %v749_v30 = vperm.slane %v307_v45, 2 }
  0xa4   :  { %v179_v11 = vadd.f32 %v178_v9, %v155_v35  ;;  %v755_v9 = vperm.slane %v307_v45, 4 }
  0xa5   :  { %195 = vadd.xlane.f32.xlu1 %v194_v5 }
  0xa6   :  { %v180_v15 = vadd.f32 %v179_v11, %v156_v6  ;;  %v757_v6 = vperm.slane %v307_v45, 5 }
  0xa8   :  { %181 = vadd.xlane.f32.xlu2 %v180_v15 }
 0x110   :  { %v189_v7 = vpop.xlane.xlu0 %188 }
 0x111   :  { %v199_v41 = vmul.f32 %v189_v7, %v602_v50 }
 0x113   :  { %v175_v16 = vpop.xlane.xlu2 %174  ;;  %v203_v10 = vadd.f32 1e-05, %v199_v41 }
 0x114   :  { %v197_v20 = vmul.f32 %v175_v16, %v602_v50 }
 0x115   :  { %400 = vrsqrt.f32 %v203_v10  ;;  %vm231_vm2 = vweird.f32 %v203_v10 }
 0x116   :  { %v201_v24 = vadd.f32 1e-05, %v197_v20 }
 0x118   :  { %402 = vrsqrt.f32 %v201_v24  ;;  %v196_v25 = vpop.xlane.xlu1 %195  ;;  %vm211_vm5 = vweird.f32 %v201_v24 }
 0x119   :  { %v200_v26 = vmul.f32 %v196_v25, %v602_v50 }
 0x11b   :  { %v401_v17 = vpop.eup %400  ;;  %v725_v33 = vadd.f32 1e-05, %v200_v26  ;;  %v182_v13 = vpop.xlane.xlu2 %181 }
 0x11c   :  { %v226_v36 = vmul.f32 %v401_v17, %v203_v10  ;;  %v198_v42 = vmul.f32 %v182_v13, %v602_v50  ;;  %vm232_vm1 = vweird.f32 %v401_v17 }
 0x11d   :  { %404 = vrsqrt.f32 %v725_v33  ;;  %vm233_vm4 = vmor %vm231_vm2, %vm232_vm1  ;;  %vm241_vm8 = vweird.f32 %v725_v33 }
 0x11e   :  { %v403_v28 = vpop.eup %402  ;;  %v227_v38 = vmul.f32 %v401_v17, %v226_v36  ;;  %v741_v54 = vadd.f32 1e-05, %v198_v42 }
 0x11f   :  { %v206_v14 = vmul.f32 %v403_v28, %v201_v24  ;;  %vm212_vm3 = vweird.f32 %v403_v28 }
 0x120   :  { %v228_v48 = vmul.f32 0.5, %v227_v38  ;;  %406 = vrsqrt.f32 %v741_v54  ;;  %vm213_vm6 = vmor %vm211_vm5, %vm212_vm3  ;;  %vm221_vm11 = vweird.f32 %v741_v54 }
 0x121   :  { %v207_v22 = vmul.f32 %v403_v28, %v206_v14 }
 0x122   :  { %v229_v53 = vsub.f32 1.5, %v228_v48 }
 0x123   :  { %v743_v50 = vpop.eup %404  ;;  %v208_v2 = vmul.f32 0.5, %v207_v22 }
 0x124   :  { %v230_v5 = vmul.f32 %v401_v17, %v229_v53  ;;  %v236_v35 = vmul.f32 %v743_v50, %v725_v33  ;;  %vm242_vm7 = vweird.f32 %v743_v50 }
 0x125   :  { %v209_v11 = vsub.f32 1.5, %v208_v2  ;;  %vm243_vm9 = vmor %vm241_vm8, %vm242_vm7 }
 0x126   :  { %v234_v15 = vsel %vm233_vm4, %v401_v17, %v230_v5  ;;  %v237_v7 = vmul.f32 %v743_v50, %v236_v35  ;;  %v780_v14 = vpop.eup %406 }
 0x127   :  { %v210_v41 = vmul.f32 %v403_v28, %v209_v11  ;;  %v257_v16 = vmul.f32 %v234_v15, %v606_v55  ;;  %v258_v10 = vmul.f32 %v234_v15, %v608_v56  ;;  %v259_v20 = vmul.f32 %v234_v15, %v610_v57 }
 0x128   :  { %v260_v25 = vmul.f32 %v234_v15, %v612_v58  ;;  %v261_v26 = vmul.f32 %v234_v15, %v614_v59  ;;  %v262_v36 = vmul.f32 %v234_v15, %v623_v63  ;;  %v238_v24 = vmul.f32 0.5, %v237_v7 }
 0x129   :  { %v214_v17 = vsel %vm213_vm6, %v403_v28, %v210_v41  ;;  %v295_v12 = vmul.f32 %v729_v43, %v257_v16  ;;  %v296_v13 = vmul.f32 %v731_v44, %v258_v10  ;;  %v297_v38 = vmul.f32 %v733_v49, %v259_v20 }
 0x12a   :  { %v245_v55 = vmul.f32 %v214_v17, %v621_v62  ;;  %v246_v56 = vmul.f32 %v214_v17, %v626_v0  ;;  %v247_v57 = vmul.f32 %v214_v17, %v631_v3  ;;  %v248_v58 = vmul.f32 %v214_v17, %v634_v8 }
 0x12b   :  { %v249_v59 = vmul.f32 %v214_v17, %v648_v18  ;;  %v250_v63 = vmul.f32 %v214_v17, %v660_v32  ;;  %v298_v28 = vmul.f32 %v735_v21, %v260_v25  ;;  %v299_v42 = vmul.f32 %v737_v51, %v261_v26 }
 0x12c   :  { %v283_v45 = vmul.f32 %v729_v43, %v245_v55  ;;  %v284_v62 = vmul.f32 %v731_v44, %v246_v56  ;;  %v285_v0 = vmul.f32 %v733_v49, %v247_v57  ;;  %v286_v3 = vmul.f32 %v735_v21, %v248_v58 }
 0x12d   :  { %v287_v8 = vmul.f32 %v737_v51, %v249_v59  ;;  %v288_v18 = vmul.f32 %v739_v23, %v250_v63  ;;  %v300_v32 = vmul.f32 %v739_v23, %v262_v36  ;;  %v333_v48 = vadd.f32 %v745_v60, %v295_v12 }
 0x12e   :  { %v321_v22 = vadd.f32 %v745_v60, %v283_v45  ;;  %v322_v53 = vadd.f32 %v747_v61, %v284_v62  ;;  %v323_v2 = vadd.f32 %v749_v30, %v285_v0  ;;  %v324_v5 = vadd.f32 %v751_v4, %v286_v3 }
 0x12f   :  { %v325_v35 = vadd.f32 %v755_v9, %v287_v8  ;;  %v326_v11 = vadd.f32 %v757_v6, %v288_v18  ;;  %v334_v15 = vadd.f32 %v747_v61, %v296_v13  ;;  %v335_v7 = vadd.f32 %v749_v30, %v297_v38 }
 0x130   :  { %v345_v41 = vpack.c.bf16 %v322_v53, %v321_v22  ;;  %v346_v16 = vpack.c.bf16 %v324_v5, %v323_v2  ;;  %v336_v10 = vadd.f32 %v751_v4, %v298_v28  ;;  %v337_v20 = vadd.f32 %v755_v9, %v299_v42 }
 0x131   :  { %v347_v25 = vpack.c.bf16 %v326_v11, %v325_v35  ;;  %v338_v26 = vadd.f32 %v757_v6, %v300_v32  ;;  %v351_v36 = vpack.c.bf16 %v334_v15, %v333_v48  ;;  %v239_v17 = vsub.f32 1.5, %v238_v24 }
 0x132   :  { %357 = vst [vmem:[#allocation8] sm:$0xff] %v345_v41  ;;  %v352_v12 = vpack.c.bf16 %v336_v10, %v335_v7  ;;  %v216_v55 = vmul.f32 %v780_v14, %v741_v54  ;;  %vm222_vm10 = vweird.f32 %v780_v14 }
 0x133   :  { %358 = vst [vmem:[#allocation8 + $0x8] sm:$0xff] %v346_v16  ;;  %v353_v13 = vpack.c.bf16 %v338_v26, %v337_v20  ;;  %v240_v38 = vmul.f32 %v743_v50, %v239_v17  ;;  %vm223_vm12 = vmor %vm221_vm11, %vm222_vm10 }
 0x134   :  { %359 = vst [vmem:[#allocation8 + $0x10] sm:$0xff] %v347_v25  ;;  %v217_v56 = vmul.f32 %v780_v14, %v216_v55 }
 0x135   :  { %363 = vst [vmem:[#allocation8 + $0x30] sm:$0xff] %v351_v36  ;;  %v244_v24 = vsel %vm243_vm9, %v743_v50, %v240_v38 }
 0x136   :  { %364 = vst [vmem:[#allocation8 + $0x38] sm:$0xff] %v352_v12  ;;  %v263_v57 = vmul.f32 %v244_v24, %v654_v27  ;;  %v264_v58 = vmul.f32 %v244_v24, %v657_v31  ;;  %v265_v59 = vmul.f32 %v244_v24, %v665_v34  ;;  %v266_v63 = vmul.f32 %v244_v24, %v668_v37 }
 0x137   :  { %365 = vst [vmem:[#allocation8 + $0x40] sm:$0xff] %v353_v13  ;;  %v267_v33 = vmul.f32 %v244_v24, %v677_v40  ;;  %v268_v28 = vmul.f32 %v244_v24, %v693_v29  ;;  %v218_v42 = vmul.f32 0.5, %v217_v56 }
 0x138   :  { %v301_v45 = vmul.f32 %v729_v43, %v263_v57  ;;  %v302_v62 = vmul.f32 %v731_v44, %v264_v58  ;;  %v303_v50 = vmul.f32 %v733_v49, %v265_v59  ;;  %v304_v27 = vmul.f32 %v735_v21, %v266_v63 }
 0x139   :  { %v305_v31 = vmul.f32 %v737_v51, %v267_v33  ;;  %v306_v34 = vmul.f32 %v739_v23, %v268_v28  ;;  %v219_v0 = vsub.f32 1.5, %v218_v42 }
 0x13a   :  { %v339_v37 = vadd.f32 %v745_v60, %v301_v45  ;;  %v340_v40 = vadd.f32 %v747_v61, %v302_v62  ;;  %v341_v29 = vadd.f32 %v749_v30, %v303_v50  ;;  %v342_v3 = vadd.f32 %v751_v4, %v304_v27 }
 0x13b   :  { %v343_v8 = vadd.f32 %v755_v9, %v305_v31  ;;  %v344_v18 = vadd.f32 %v757_v6, %v306_v34  ;;  %v220_v32 = vmul.f32 %v780_v14, %v219_v0 }
 0x13c   :  { %v354_v48 = vpack.c.bf16 %v340_v40, %v339_v37  ;;  %v355_v22 = vpack.c.bf16 %v342_v3, %v341_v29 }
 0x13d   :  { %v356_v53 = vpack.c.bf16 %v344_v18, %v343_v8  ;;  %v224_v2 = vsel %vm223_vm12, %v780_v14, %v220_v32 }
 0x13e   :  { %366 = vst [vmem:[#allocation8 + $0x48] sm:$0xff] %v354_v48  ;;  %v251_v5 = vmul.f32 %v224_v2, %v682_v19  ;;  %v252_v35 = vmul.f32 %v224_v2, %v687_v46  ;;  %v253_v11 = vmul.f32 %v224_v2, %v690_v47  ;;  %v254_v15 = vmul.f32 %v224_v2, %v700_v52 }
 0x13f   :  { %367 = vst [vmem:[#allocation8 + $0x50] sm:$0xff] %v355_v22  ;;  %v255_v7 = vmul.f32 %v224_v2, %v707_v39  ;;  %v256_v54 = vmul.f32 %v224_v2, %v714_v1 }
 0x140   :  { %368 = vst [vmem:[#allocation8 + $0x58] sm:$0xff] %v356_v53  ;;  %v289_v41 = vmul.f32 %v729_v43, %v251_v5  ;;  %v290_v16 = vmul.f32 %v731_v44, %v252_v35  ;;  %v291_v14 = vmul.f32 %v733_v49, %v253_v11  ;;  %v292_v19 = vmul.f32 %v735_v21, %v254_v15 }
 0x141   :  { %v293_v46 = vmul.f32 %v737_v51, %v255_v7  ;;  %v294_v47 = vmul.f32 %v739_v23, %v256_v54 }
 0x142   :  { %v327_v52 = vadd.f32 %v745_v60, %v289_v41  ;;  %v328_v10 = vadd.f32 %v747_v61, %v290_v16  ;;  %v329_v39 = vadd.f32 %v749_v30, %v291_v14  ;;  %v330_v1 = vadd.f32 %v751_v4, %v292_v19 }
 0x143   :  { %v331_v43 = vadd.f32 %v755_v9, %v293_v46  ;;  %v332_v44 = vadd.f32 %v757_v6, %v294_v47 }
 0x144   :  { %v348_v49 = vpack.c.bf16 %v328_v10, %v327_v52  ;;  %v349_v21 = vpack.c.bf16 %v330_v1, %v329_v39 }
 0x145   :  { %v350_v51 = vpack.c.bf16 %v332_v44, %v331_v43 }
 0x146   :  { %360 = vst [vmem:[#allocation8 + $0x18] sm:$0xff] %v348_v49 }
 0x147   :  { %361 = vst [vmem:[#allocation8 + $0x20] sm:$0xff] %v349_v21 }
 0x148   :  { %362 = vst [vmem:[#allocation8 + $0x28] sm:$0xff] %v350_v51 }
 0x149   :  { %381 = dma.vmem_to_hbm [thread:$0]  %s374_s2, 1536, %s376_s30, [#allocation4], %s517_s4, %s517_s4, %s518_s5  }
 0x14a   :  { %508 = dma.done.wait [#allocation4], 1536  }
 0x14b   :  { %509 = vsyncadd [#allocation4], 4294965760 }
 0x14c   :  { %386 = vsyncpa [#allocation3], 1 }
 0x14d   :  { %387 = vsyncpa [#allocation6], 1 }
 0x14e   :  { %388 = vsyncpa [#allocation4], 1 }

</bundles_post_ra>
